<compile_context>
chip_gen: v7x
topology: tpu7x:2x2x1
jax: 0.10.0
libtpu: 0.0.40
codegen_flags: <defaults>
</compile_context>

<pallas_src>
import functools

import jax
import jax.numpy as jnp
from jax.experimental import pallas as pl
from jax.experimental.pallas import tpu as pltpu

BN_EPS = 1e-5  # PyTorch BatchNorm1d default


def _ru(n, m):
    """Round n up to a multiple of m."""
    return ((n + m - 1) // m) * m


def _pad2(a, rows, cols, dtype=None):
    """Zero-pad a 2-D array to (rows, cols) and optionally cast."""
    r, c = a.shape
    if r != rows or c != cols:
        a = jnp.pad(a, ((0, rows - r), (0, cols - c)))
    if dtype is not None and a.dtype != dtype:
        a = a.astype(dtype)
    return a


def _vmem_limit(nbytes):
    """Scoped-VMEM cap from the actual tile/scratch footprint (with headroom)."""
    # 2x headroom + 4 MiB slack, floored at 32 MiB; capped at 64 MiB (v7x-safe).
    return int(min(max(2 * nbytes + (4 << 20), 32 << 20), 64 << 20))


# ---------------------------------------------------------------------------
# Fused kernel: grid = (2 phases, nbt batch tiles).
#   phase 0: h = x @ w1 (f32 accumulation), accumulate sum / sumsq in f32, and
#            stash h (compute dtype) in a persistent VMEM scratch.
#   phase 1: at tile 0 fold the stats into BN scale/shift, then BN+ReLU+fc2.
# The hidden activation h never touches HBM.
# ---------------------------------------------------------------------------
def fused_mlp_kernel(x_ref, w1_ref, gamma_ref, beta_ref, w2_ref, b2_ref,
                     o_ref, h_all, sum_sc, sq_sc, scale_sc, shift_sc,
                     *, inv_b):
    phase = pl.program_id(0)
    i = pl.program_id(1)

    @pl.when(phase == 0)
    def _fc1_and_stats():
        @pl.when(i == 0)
        def _init():
            sum_sc[...] = jnp.zeros_like(sum_sc)
            sq_sc[...] = jnp.zeros_like(sq_sc)

        h = jnp.dot(x_ref[...], w1_ref[...], preferred_element_type=jnp.float32)
        sum_sc[...] += jnp.sum(h, axis=0, keepdims=True)
        sq_sc[...] += jnp.sum(h * h, axis=0, keepdims=True)
        h_all[i] = h.astype(h_all.dtype)

    @pl.when(phase == 1)
    def _bn_relu_fc2():
        @pl.when(i == 0)
        def _fold_stats():
            mean = sum_sc[...] * inv_b                      # (1, Hp), f32
            var = jnp.maximum(sq_sc[...] * inv_b - mean * mean, 0.0)
            scale = gamma_ref[...] * jax.lax.rsqrt(var + BN_EPS)   # EUP
            scale_sc[...] = scale
            shift_sc[...] = beta_ref[...] - mean * scale

        h = h_all[i].astype(jnp.float32)
        h_act = jnp.maximum(h * scale_sc[...] + shift_sc[...], 0.0)
        out = jnp.dot(h_act.astype(w2_ref.dtype), w2_ref[...],
                      preferred_element_type=jnp.float32)
        o_ref[...] = (out + b2_ref[...]).astype(o_ref.dtype)


# ---------------------------------------------------------------------------
# Two-pass fallback, pass 1: h = x @ w1 plus *per-tile* partial stats, so the
# batch-tile axis carries no cross-iteration dependence ("parallel" / megacore).
# ---------------------------------------------------------------------------
def fc1_stats_kernel(x_ref, w1_ref, h_ref, psum_ref, psq_ref):
    h = jnp.dot(x_ref[...], w1_ref[...], preferred_element_type=jnp.float32)
    h_ref[...] = h.astype(h_ref.dtype)
    psum_ref[...] = jnp.sum(h, axis=0, keepdims=True).reshape(psum_ref.shape)
    psq_ref[...] = jnp.sum(h * h, axis=0, keepdims=True).reshape(psq_ref.shape)


# ---------------------------------------------------------------------------
# Two-pass fallback, pass 2: BN(scale/shift precomputed) -> ReLU -> fc2.
# ---------------------------------------------------------------------------
def bn_relu_fc2_kernel(h_ref, scale_ref, shift_ref, w2_ref, b2_ref, o_ref):
    h = h_ref[...].astype(jnp.float32)
    h_act = jnp.maximum(h * scale_ref[...] + shift_ref[...], 0.0)
    out = jnp.dot(h_act.astype(w2_ref.dtype), w2_ref[...],
                  preferred_element_type=jnp.float32)
    o_ref[...] = (out + b2_ref[...]).astype(o_ref.dtype)


def mlp_forward(x, w1, b1, gamma, beta, w2, b2, *, tile_b=512,
                compute_dtype=jnp.bfloat16,
                fused_vmem_budget_bytes=40 * 1024 * 1024):
    """Forward of MLP(input_dims, hidden_dims, output_dims, batch_norm=True).

    b1 is accepted for nn.Linear API parity but intentionally unused inside the
    kernels: BatchNorm's batch-mean subtraction cancels any per-feature constant.
    """
    del b1

    B, d_in = x.shape
    H = w1.shape[1]
    d_out = w2.shape[1]
    out_dtype = x.dtype
    f32 = jnp.float32
    cbytes = jnp.dtype(compute_dtype).itemsize
    obytes = jnp.dtype(out_dtype).itemsize

    # Lane-dense / MXU-friendly feature dims.
    d_in_p = _ru(d_in, 128)
    h_p = _ru(H, 128)
    d_out_p = _ru(d_out, 128)

    # Batch tiling: large tiles amortize the ~0.35us/step pipeline overhead.
    # Pad the batch only to a multiple of 8 when a reasonable dividing tile
    # exists; otherwise pad to a full tile.
    b_p = _ru(B, 8)
    tb0 = min(_ru(tile_b, 8), b_p)
    tb = tb0
    while b_p % tb != 0:
        tb -= 8
    if tb < max(8, tb0 // 4):
        tb = tb0
        b_p = _ru(B, tb)
    nbt = b_p // tb

    xp = _pad2(x, b_p, d_in_p, compute_dtype)
    w1p = _pad2(w1, d_in_p, h_p, compute_dtype)
    w2p = _pad2(w2, h_p, d_out_p, compute_dtype)
    gammap = _pad2(jnp.reshape(gamma, (1, -1)), 1, h_p, f32)
    betap = _pad2(jnp.reshape(beta, (1, -1)), 1, h_p, f32)
    b2p = _pad2(jnp.reshape(b2, (1, -1)), 1, d_out_p, f32)

    inv_b = 1.0 / B  # true batch size: zero-padded rows contribute 0 to stats

    weights_bytes = (d_in_p * h_p + h_p * d_out_p) * cbytes
    small_bytes = (2 * h_p + d_out_p) * 4

    # ----------------- fused single-kernel path (h stays in VMEM) -----------
    fused_bytes = (nbt * tb * h_p * cbytes              # persistent h scratch
                   + 4 * h_p * 4                        # sum/sq/scale/shift
                   + 2 * (tb * d_in_p * cbytes          # x (double-buffered)
                          + tb * d_out_p * obytes       # out (double-buffered)
                          + weights_bytes + small_bytes))
    if fused_bytes <= fused_vmem_budget_bytes:
        out_p = pl.pallas_call(
            functools.partial(fused_mlp_kernel, inv_b=inv_b),
            grid=(2, nbt),
            in_specs=[
                # Phase 0 streams x tiles; phase 1 keeps the last tile's index
                # (unchanged index -> no extra DMA, x unused in phase 1).
                pl.BlockSpec((tb, d_in_p),
                             lambda p, i: ((1 - p) * i + p * (nbt - 1), 0)),
                pl.BlockSpec((d_in_p, h_p), lambda p, i: (0, 0)),    # w1
                pl.BlockSpec((1, h_p), lambda p, i: (0, 0)),         # gamma
                pl.BlockSpec((1, h_p), lambda p, i: (0, 0)),         # beta
                pl.BlockSpec((h_p, d_out_p), lambda p, i: (0, 0)),   # w2
                pl.BlockSpec((1, d_out_p), lambda p, i: (0, 0)),     # b2
            ],
            out_specs=pl.BlockSpec((tb, d_out_p), lambda p, i: (p * i, 0)),
            out_shape=jax.ShapeDtypeStruct((b_p, d_out_p), out_dtype),
            scratch_shapes=[
                pltpu.VMEM((nbt, tb, h_p), compute_dtype),   # resident h
                pltpu.VMEM((1, h_p), f32),                   # sum
                pltpu.VMEM((1, h_p), f32),                   # sumsq
                pltpu.VMEM((1, h_p), f32),                   # BN scale
                pltpu.VMEM((1, h_p), f32),                   # BN shift
            ],
            compiler_params=pltpu.CompilerParams(
                # Phase 1 depends on phase 0's stats and the stats accumulate
                # across batch tiles -> both axes sequential.
                dimension_semantics=("arbitrary", "arbitrary"),
                vmem_limit_bytes=_vmem_limit(fused_bytes)),
            cost_estimate=pl.CostEstimate(
                flops=2 * b_p * h_p * (d_in_p + d_out_p),
                transcendentals=h_p,
                bytes_accessed=(b_p * d_in_p * cbytes + weights_bytes
                                + small_bytes + b_p * d_out_p * obytes)),
        )(xp, w1p, gammap, betap, w2p, b2p)
        return out_p[:B, :d_out]

    # --------------- two-pass fallback (h streamed through HBM) -------------
    pass1_bytes = 2 * (tb * d_in_p * cbytes + d_in_p * h_p * cbytes
                       + tb * h_p * cbytes + 2 * h_p * 4)
    h, psum, psq = pl.pallas_call(
        fc1_stats_kernel,
        grid=(nbt,),
        in_specs=[
            pl.BlockSpec((tb, d_in_p), lambda i: (i, 0)),     # x tile (streamed)
            pl.BlockSpec((d_in_p, h_p), lambda i: (0, 0)),    # w1 (resident)
        ],
        out_specs=(
            pl.BlockSpec((tb, h_p), lambda i: (i, 0)),        # h tile
            pl.BlockSpec((1, 1, h_p), lambda i: (i, 0, 0)),   # per-tile sum
            pl.BlockSpec((1, 1, h_p), lambda i: (i, 0, 0)),   # per-tile sumsq
        ),
        out_shape=(
            jax.ShapeDtypeStruct((b_p, h_p), compute_dtype),
            jax.ShapeDtypeStruct((nbt, 1, h_p), f32),
            jax.ShapeDtypeStruct((nbt, 1, h_p), f32),
        ),
        compiler_params=pltpu.CompilerParams(
            # Per-tile partial stats -> no cross-tile dependence -> megacore OK.
            dimension_semantics=("parallel",),
            vmem_limit_bytes=_vmem_limit(pass1_bytes)),
        cost_estimate=pl.CostEstimate(
            flops=2 * b_p * d_in_p * h_p,
            transcendentals=0,
            bytes_accessed=(b_p * d_in_p * cbytes + d_in_p * h_p * cbytes
                            + b_p * h_p * cbytes + 2 * nbt * h_p * 4)),
    )(xp, w1p)

    # Fold the tiny per-tile partials into BN scale/shift once, in JAX.
    mean = jnp.sum(psum[:, 0, :], axis=0, keepdims=True) * inv_b
    var = jnp.maximum(
        jnp.sum(psq[:, 0, :], axis=0, keepdims=True) * inv_b - mean * mean, 0.0)
    scale = gammap * jax.lax.rsqrt(var + BN_EPS)
    shift = betap - mean * scale

    pass2_bytes = 2 * (tb * h_p * cbytes + h_p * d_out_p * cbytes
                       + (2 * h_p + d_out_p) * 4 + tb * d_out_p * obytes)
    out_p = pl.pallas_call(
        bn_relu_fc2_kernel,
        grid=(nbt,),
        in_specs=[
            pl.BlockSpec((tb, h_p), lambda i: (i, 0)),        # h tile (streamed)
            pl.BlockSpec((1, h_p), lambda i: (0, 0)),         # BN scale
            pl.BlockSpec((1, h_p), lambda i: (0, 0)),         # BN shift
            pl.BlockSpec((h_p, d_out_p), lambda i: (0, 0)),   # w2 (resident)
            pl.BlockSpec((1, d_out_p), lambda i: (0, 0)),     # b2
        ],
        out_specs=pl.BlockSpec((tb, d_out_p), lambda i: (i, 0)),
        out_shape=jax.ShapeDtypeStruct((b_p, d_out_p), out_dtype),
        compiler_params=pltpu.CompilerParams(
            dimension_semantics=("parallel",),
            vmem_limit_bytes=_vmem_limit(pass2_bytes)),
        cost_estimate=pl.CostEstimate(
            flops=2 * b_p * h_p * d_out_p + 4 * b_p * h_p,
            transcendentals=0,
            bytes_accessed=(b_p * h_p * cbytes + h_p * d_out_p * cbytes
                            + (2 * h_p + d_out_p) * 4 + b_p * d_out_p * obytes)),
    )(h, scale, shift, w2p, b2p)
    return out_p[:B, :d_out]


def mlp_reference(x, w1, b1, gamma, beta, w2, b2):
    # Full PyTorch semantics INCLUDING the fc1 bias, to verify that dropping it
    # inside the kernels (cancelled by BN mean subtraction) is exact.
    h = x @ w1 + b1
    mean = jnp.mean(h, axis=0, keepdims=True)
    var = jnp.mean((h - mean) ** 2, axis=0, keepdims=True)
    h = (h - mean) / jnp.sqrt(var + BN_EPS) * gamma + beta
    h = jnp.maximum(h, 0.0)
    return h @ w2 + b2


if __name__ == "__main__":
    # Small shapes consistent with the module's 2-D forward.
    B, D_IN, H, D_OUT = 128, 16, 32, 8

    key = jax.random.PRNGKey(0)
    kx, kw1, kb1, kw2, kb2 = jax.random.split(key, 5)

    x = jax.random.normal(kx, (B, D_IN), dtype=jnp.float32)

    lim1 = 1.0 / (D_IN ** 0.5)
    w1 = jax.random.uniform(kw1, (D_IN, H), minval=-lim1, maxval=lim1, dtype=jnp.float32)
    b1 = jax.random.uniform(kb1, (1, H), minval=-lim1, maxval=lim1, dtype=jnp.float32)

    gamma = jnp.ones((1, H), dtype=jnp.float32)   # BatchNorm1d affine init
    beta = jnp.zeros((1, H), dtype=jnp.float32)

    lim2 = 1.0 / (H ** 0.5)
    w2 = jax.random.uniform(kw2, (H, D_OUT), minval=-lim2, maxval=lim2, dtype=jnp.float32)
    b2 = jax.random.uniform(kb2, (1, D_OUT), minval=-lim2, maxval=lim2, dtype=jnp.float32)

    ref = mlp_reference(x, w1, b1, gamma, beta, w2, b2)

    # Exactness check of BOTH code paths with f32 MXU operands; tile_b=32 so
    # the batch-tile loop / cross-tile statistics are actually exercised.
    out_fused = jax.block_until_ready(
        mlp_forward(x, w1, b1, gamma, beta, w2, b2,
                    tile_b=32, compute_dtype=jnp.float32))
    out_2pass = jax.block_until_ready(
        mlp_forward(x, w1, b1, gamma, beta, w2, b2,
                    tile_b=32, compute_dtype=jnp.float32,
                    fused_vmem_budget_bytes=0))          # force two-pass path
    assert out_fused.shape == (B, D_OUT)
    assert jnp.allclose(out_fused, ref, atol=2e-4, rtol=2e-4), \
        float(jnp.max(jnp.abs(out_fused - ref)))
    assert jnp.allclose(out_2pass, ref, atol=2e-4, rtol=2e-4), \
        float(jnp.max(jnp.abs(out_2pass - ref)))

    # Default fast path: bf16 MXU operands / bf16 h, f32 accumulation + BN math.
    # Loose tolerance is only the bf16 quantization of x / w1 / w2 / h.
    out_fast = jax.block_until_ready(
        mlp_forward(x, w1, b1, gamma, beta, w2, b2, tile_b=32))
    assert out_fast.shape == (B, D_OUT)
    assert jnp.allclose(out_fast, ref, atol=1.5e-1, rtol=1e-1), \
        float(jnp.max(jnp.abs(out_fast - ref)))

    print("KERNEL_OK")
</pallas_src>

<mosaic_0001>
module attributes {stable_mosaic.version = 11 : i64} {
  func.func @fused_mlp_kernel(%arg0: i32, %arg1: i32, %arg2: memref<32x128xf32, #tpu.memory_space<vmem>>, %arg3: memref<128x128xf32, #tpu.memory_space<vmem>>, %arg4: memref<1x128xf32, #tpu.memory_space<vmem>>, %arg5: memref<1x128xf32, #tpu.memory_space<vmem>>, %arg6: memref<128x128xf32, #tpu.memory_space<vmem>>, %arg7: memref<1x128xf32, #tpu.memory_space<vmem>>, %arg8: memref<32x128xf32, #tpu.memory_space<vmem>>, %arg9: memref<4x32x128xf32, #tpu.memory_space<vmem>>, %arg10: memref<1x128xf32, #tpu.memory_space<vmem>>, %arg11: memref<1x128xf32, #tpu.memory_space<vmem>>, %arg12: memref<1x128xf32, #tpu.memory_space<vmem>>, %arg13: memref<1x128xf32, #tpu.memory_space<vmem>>) attributes {dimension_semantics = [#tpu.dimension_semantics<arbitrary>, #tpu.dimension_semantics<arbitrary>], iteration_bounds = array<i64: 2, 4>, scalar_prefetch = 0 : i64, scratch_operands = 5 : i64, tpu.core_type = #tpu.core_type<tc>, window_params = [{transform_indices = @transform_0, window_bounds = array<i64: 32, 128>}, {pipeline_mode = #tpu.pipeline_mode<synchronous>, transform_indices = @transform_1, window_bounds = array<i64: 128, 128>}, {pipeline_mode = #tpu.pipeline_mode<synchronous>, transform_indices = @transform_2, window_bounds = array<i64: 1, 128>}, {pipeline_mode = #tpu.pipeline_mode<synchronous>, transform_indices = @transform_3, window_bounds = array<i64: 1, 128>}, {pipeline_mode = #tpu.pipeline_mode<synchronous>, transform_indices = @transform_4, window_bounds = array<i64: 128, 128>}, {pipeline_mode = #tpu.pipeline_mode<synchronous>, transform_indices = @transform_5, window_bounds = array<i64: 1, 128>}, {transform_indices = @transform_6, window_bounds = array<i64: 32, 128>}]} {
    %c0_i32 = arith.constant 0 : i32
    %0 = arith.cmpi eq, %arg0, %c0_i32 : i32
    %1 = arith.extui %0 : i1 to i32
    %c0_i32_0 = arith.constant 0 : i32
    %2 = arith.cmpi ne, %1, %c0_i32_0 : i32
    scf.if %2 {
      %c0_i32_2 = arith.constant 0 : i32
      %6 = arith.cmpi eq, %arg1, %c0_i32_2 : i32
      %7 = arith.extui %6 : i1 to i32
      %c0_i32_3 = arith.constant 0 : i32
      %8 = arith.cmpi ne, %7, %c0_i32_3 : i32
      scf.if %8 {
        %cst_19 = arith.constant 0.000000e+00 : f32
        %27 = vector.broadcast %cst_19 : f32 to vector<1x128xf32>
        %c0_20 = arith.constant 0 : index
        %c0_21 = arith.constant 0 : index
        %28 = vector.load %arg10[%c0_20, %c0_21] : memref<1x128xf32, #tpu.memory_space<vmem>>, vector<1x128xf32>
        tpu.vector_store %arg10[%c0_20, %c0_21], %27 {strides = array<i32>} : memref<1x128xf32, #tpu.memory_space<vmem>>, vector<1x128xf32>,
        %cst_22 = arith.constant 0.000000e+00 : f32
        %29 = vector.broadcast %cst_22 : f32 to vector<1x128xf32>
        %c0_23 = arith.constant 0 : index
        %c0_24 = arith.constant 0 : index
        %30 = vector.load %arg11[%c0_23, %c0_24] : memref<1x128xf32, #tpu.memory_space<vmem>>, vector<1x128xf32>
        tpu.vector_store %arg11[%c0_23, %c0_24], %29 {strides = array<i32>} : memref<1x128xf32, #tpu.memory_space<vmem>>, vector<1x128xf32>,
      } else {
      }
      %c0 = arith.constant 0 : index
      %c0_4 = arith.constant 0 : index
      %9 = vector.load %arg2[%c0, %c0_4] : memref<32x128xf32, #tpu.memory_space<vmem>>, vector<32x128xf32>
      %c0_5 = arith.constant 0 : index
      %c0_6 = arith.constant 0 : index
      %10 = vector.load %arg3[%c0_5, %c0_6] : memref<128x128xf32, #tpu.memory_space<vmem>>, vector<128x128xf32>
      %cst = arith.constant dense<0.000000e+00> : vector<32x128xf32>
      %11 = tpu.matmul %9, %10, %cst {dimension_numbers = #tpu.dot_dimension_numbers<[1], [0], [0], [1], [0, 0, 1, 1], [], []>} : vector<32x128xf32>, vector<128x128xf32>, vector<32x128xf32> -> vector<32x128xf32>
      %c0_7 = arith.constant 0 : index
      %c0_8 = arith.constant 0 : index
      %12 = vector.load %arg10[%c0_7, %c0_8] : memref<1x128xf32, #tpu.memory_space<vmem>>, vector<1x128xf32>
      %cst_9 = arith.constant dense<0.000000e+00> : vector<128xf32>
      %13 = vector.multi_reduction <add>, %11, %cst_9 [0] : vector<32x128xf32> to vector<128xf32>
      %14 = vector.shape_cast %13 : vector<128xf32> to vector<1x128xf32>
      %15 = arith.addf %12, %14 : vector<1x128xf32>
      %c0_10 = arith.constant 0 : index
      %c0_11 = arith.constant 0 : index
      %16 = vector.load %arg10[%c0_10, %c0_11] : memref<1x128xf32, #tpu.memory_space<vmem>>, vector<1x128xf32>
      tpu.vector_store %arg10[%c0_10, %c0_11], %15 {strides = array<i32>} : memref<1x128xf32, #tpu.memory_space<vmem>>, vector<1x128xf32>,
      %c0_12 = arith.constant 0 : index
      %c0_13 = arith.constant 0 : index
      %17 = vector.load %arg11[%c0_12, %c0_13] : memref<1x128xf32, #tpu.memory_space<vmem>>, vector<1x128xf32>
      %18 = arith.mulf %11, %11 : vector<32x128xf32>
      %cst_14 = arith.constant dense<0.000000e+00> : vector<128xf32>
      %19 = vector.multi_reduction <add>, %18, %cst_14 [0] : vector<32x128xf32> to vector<128xf32>
      %20 = vector.shape_cast %19 : vector<128xf32> to vector<1x128xf32>
      %21 = arith.addf %17, %20 : vector<1x128xf32>
      %c0_15 = arith.constant 0 : index
      %c0_16 = arith.constant 0 : index
      %22 = vector.load %arg11[%c0_15, %c0_16] : memref<1x128xf32, #tpu.memory_space<vmem>>, vector<1x128xf32>
      tpu.vector_store %arg11[%c0_15, %c0_16], %21 {strides = array<i32>} : memref<1x128xf32, #tpu.memory_space<vmem>>, vector<1x128xf32>,
      %23 = arith.index_cast %arg1 : i32 to index
      %c0_17 = arith.constant 0 : index
      %c0_18 = arith.constant 0 : index
      %24 = vector.load %arg9[%23, %c0_17, %c0_18] : memref<4x32x128xf32, #tpu.memory_space<vmem>>, vector<1x32x128xf32>
      %25 = vector.shape_cast %24 : vector<1x32x128xf32> to vector<32x128xf32>
      %26 = vector.shape_cast %11 : vector<32x128xf32> to vector<1x32x128xf32>
      tpu.vector_store %arg9[%23, %c0_17, %c0_18], %26 {strides = array<i32>} : memref<4x32x128xf32, #tpu.memory_space<vmem>>, vector<1x32x128xf32>,
    } else {
    }
    %c1_i32 = arith.constant 1 : i32
    %3 = arith.cmpi eq, %arg0, %c1_i32 : i32
    %4 = arith.extui %3 : i1 to i32
    %c0_i32_1 = arith.constant 0 : i32
    %5 = arith.cmpi ne, %4, %c0_i32_1 : i32
    scf.if %5 {
      %c0_i32_2 = arith.constant 0 : i32
      %6 = arith.cmpi eq, %arg1, %c0_i32_2 : i32
      %7 = arith.extui %6 : i1 to i32
      %c0_i32_3 = arith.constant 0 : i32
      %8 = arith.cmpi ne, %7, %c0_i32_3 : i32
      scf.if %8 {
        %c0_16 = arith.constant 0 : index
        %c0_17 = arith.constant 0 : index
        %26 = vector.load %arg10[%c0_16, %c0_17] : memref<1x128xf32, #tpu.memory_space<vmem>>, vector<1x128xf32>
        %cst_18 = arith.constant 7.812500e-03 : f32
        %27 = vector.broadcast %cst_18 : f32 to vector<1x128xf32>
        %28 = arith.mulf %26, %27 : vector<1x128xf32>
        %c0_19 = arith.constant 0 : index
        %c0_20 = arith.constant 0 : index
        %29 = vector.load %arg11[%c0_19, %c0_20] : memref<1x128xf32, #tpu.memory_space<vmem>>, vector<1x128xf32>
        %cst_21 = arith.constant 7.812500e-03 : f32
        %30 = vector.broadcast %cst_21 : f32 to vector<1x128xf32>
        %31 = arith.mulf %29, %30 : vector<1x128xf32>
        %32 = arith.mulf %28, %28 : vector<1x128xf32>
        %33 = arith.subf %31, %32 : vector<1x128xf32>
        %cst_22 = arith.constant 0.000000e+00 : f32
        %34 = vector.broadcast %cst_22 : f32 to vector<1x128xf32>
        %35 = arith.maximumf %33, %34 : vector<1x128xf32>
        %c0_23 = arith.constant 0 : index
        %c0_24 = arith.constant 0 : index
        %36 = vector.load %arg4[%c0_23, %c0_24] : memref<1x128xf32, #tpu.memory_space<vmem>>, vector<1x128xf32>
        %cst_25 = arith.constant 9.99999974E-6 : f32
        %37 = vector.broadcast %cst_25 : f32 to vector<1x128xf32>
        %38 = arith.addf %35, %37 : vector<1x128xf32>
        %39 = math.rsqrt %38 : vector<1x128xf32>
        %40 = arith.mulf %36, %39 : vector<1x128xf32>
        %c0_26 = arith.constant 0 : index
        %c0_27 = arith.constant 0 : index
        %41 = vector.load %arg12[%c0_26, %c0_27] : memref<1x128xf32, #tpu.memory_space<vmem>>, vector<1x128xf32>
        tpu.vector_store %arg12[%c0_26, %c0_27], %40 {strides = array<i32>} : memref<1x128xf32, #tpu.memory_space<vmem>>, vector<1x128xf32>,
        %c0_28 = arith.constant 0 : index
        %c0_29 = arith.constant 0 : index
        %42 = vector.load %arg5[%c0_28, %c0_29] : memref<1x128xf32, #tpu.memory_space<vmem>>, vector<1x128xf32>
        %43 = arith.mulf %28, %40 : vector<1x128xf32>
        %44 = arith.subf %42, %43 : vector<1x128xf32>
        %c0_30 = arith.constant 0 : index
        %c0_31 = arith.constant 0 : index
        %45 = vector.load %arg13[%c0_30, %c0_31] : memref<1x128xf32, #tpu.memory_space<vmem>>, vector<1x128xf32>
        tpu.vector_store %arg13[%c0_30, %c0_31], %44 {strides = array<i32>} : memref<1x128xf32, #tpu.memory_space<vmem>>, vector<1x128xf32>,
      } else {
      }
      %9 = arith.index_cast %arg1 : i32 to index
      %c0 = arith.constant 0 : index
      %c0_4 = arith.constant 0 : index
      %10 = vector.load %arg9[%9, %c0, %c0_4] : memref<4x32x128xf32, #tpu.memory_space<vmem>>, vector<1x32x128xf32>
      %11 = vector.shape_cast %10 : vector<1x32x128xf32> to vector<32x128xf32>
      %c0_5 = arith.constant 0 : index
      %c0_6 = arith.constant 0 : index
      %12 = vector.load %arg12[%c0_5, %c0_6] : memref<1x128xf32, #tpu.memory_space<vmem>>, vector<1x128xf32>
      %13 = vector.broadcast %12 : vector<1x128xf32> to vector<32x128xf32>
      %14 = arith.mulf %11, %13 : vector<32x128xf32>
      %c0_7 = arith.constant 0 : index
      %c0_8 = arith.constant 0 : index
      %15 = vector.load %arg13[%c0_7, %c0_8] : memref<1x128xf32, #tpu.memory_space<vmem>>, vector<1x128xf32>
      %16 = vector.broadcast %15 : vector<1x128xf32> to vector<32x128xf32>
      %17 = arith.addf %14, %16 : vector<32x128xf32>
      %cst = arith.constant 0.000000e+00 : f32
      %18 = vector.broadcast %cst : f32 to vector<32x128xf32>
      %19 = arith.maximumf %17, %18 : vector<32x128xf32>
      %c0_9 = arith.constant 0 : index
      %c0_10 = arith.constant 0 : index
      %20 = vector.load %arg6[%c0_9, %c0_10] : memref<128x128xf32, #tpu.memory_space<vmem>>, vector<128x128xf32>
      %cst_11 = arith.constant dense<0.000000e+00> : vector<32x128xf32>
      %21 = tpu.matmul %19, %20, %cst_11 {dimension_numbers = #tpu.dot_dimension_numbers<[1], [0], [0], [1], [0, 0, 1, 1], [], []>} : vector<32x128xf32>, vector<128x128xf32>, vector<32x128xf32> -> vector<32x128xf32>
      %c0_12 = arith.constant 0 : index
      %c0_13 = arith.constant 0 : index
      %22 = vector.load %arg7[%c0_12, %c0_13] : memref<1x128xf32, #tpu.memory_space<vmem>>, vector<1x128xf32>
      %23 = vector.broadcast %22 : vector<1x128xf32> to vector<32x128xf32>
      %24 = arith.addf %21, %23 : vector<32x128xf32>
      %c0_14 = arith.constant 0 : index
      %c0_15 = arith.constant 0 : index
      %25 = vector.load %arg8[%c0_14, %c0_15] : memref<32x128xf32, #tpu.memory_space<vmem>>, vector<32x128xf32>
      tpu.vector_store %arg8[%c0_14, %c0_15], %24 {strides = array<i32>} : memref<32x128xf32, #tpu.memory_space<vmem>>, vector<32x128xf32>,
    } else {
    }
    return
  }
  func.func @transform_0(%arg0: i32, %arg1: i32) -> (i32, i32) {
    %c1_i32 = arith.constant 1 : i32
    %0 = arith.subi %c1_i32, %arg0 : i32
    %1 = arith.muli %0, %arg1 : i32
    %c3_i32 = arith.constant 3 : i32
    %2 = arith.muli %arg0, %c3_i32 : i32
    %3 = arith.addi %1, %2 : i32
    %c0_i32 = arith.constant 0 : i32
    %c0_i32_0 = arith.constant 0 : i32
    return %3, %c0_i32 : i32, i32
  }
  func.func @transform_1(%arg0: i32, %arg1: i32) -> (i32, i32) {
    %c0_i32 = arith.constant 0 : i32
    %c0_i32_0 = arith.constant 0 : i32
    %c0_i32_1 = arith.constant 0 : i32
    return %c0_i32, %c0_i32_0 : i32, i32
  }
  func.func @transform_2(%arg0: i32, %arg1: i32) -> (i32, i32) {
    %c0_i32 = arith.constant 0 : i32
    %c0_i32_0 = arith.constant 0 : i32
    %c0_i32_1 = arith.constant 0 : i32
    return %c0_i32, %c0_i32_0 : i32, i32
  }
  func.func @transform_3(%arg0: i32, %arg1: i32) -> (i32, i32) {
    %c0_i32 = arith.constant 0 : i32
    %c0_i32_0 = arith.constant 0 : i32
    %c0_i32_1 = arith.constant 0 : i32
    return %c0_i32, %c0_i32_0 : i32, i32
  }
  func.func @transform_4(%arg0: i32, %arg1: i32) -> (i32, i32) {
    %c0_i32 = arith.constant 0 : i32
    %c0_i32_0 = arith.constant 0 : i32
    %c0_i32_1 = arith.constant 0 : i32
    return %c0_i32, %c0_i32_0 : i32, i32
  }
  func.func @transform_5(%arg0: i32, %arg1: i32) -> (i32, i32) {
    %c0_i32 = arith.constant 0 : i32
    %c0_i32_0 = arith.constant 0 : i32
    %c0_i32_1 = arith.constant 0 : i32
    return %c0_i32, %c0_i32_0 : i32, i32
  }
  func.func @transform_6(%arg0: i32, %arg1: i32) -> (i32, i32) {
    %0 = arith.muli %arg0, %arg1 : i32
    %c0_i32 = arith.constant 0 : i32
    %c0_i32_0 = arith.constant 0 : i32
    return %0, %c0_i32 : i32, i32
  }
}

</mosaic_0001>

<bundles_post_ra>
// kernel: tpu_custom_call.1
= control target key start
LH: loop header
LB: loop body
LE: loop exit
PB: predicated region body
PF: predicated region fallthrough
CT: control target
= control target key end

     0   :  { %s1752_s0 = inlined_call_operand.hbm [shape: f32[128,128], index: 0, kind: input, shape index: {}]   ;;  %s1753_s1 = inlined_call_operand.hbm [shape: f32[128,128], index: 1, kind: input, shape index: {}]   ;;  %s1754_s2 = inlined_call_operand.vmem [shape: f32[1,128], index: 2, kind: input, shape index: {}]   ;;  %s1755_s3 = inlined_call_operand.vmem [shape: f32[1,128], index: 3, kind: input, shape index: {}]   ;;  %s1756_s4 = inlined_call_operand.hbm [shape: f32[128,128], index: 4, kind: input, shape index: {}]   ;;  %s1757_s5 = inlined_call_operand.vmem [shape: f32[1,128], index: 5, kind: input, shape index: {}]   ;;  %s1758_s6 = inlined_call_operand.hbm [shape: f32[128,128], index: 6, kind: output, shape index: {}]  }
   0x1   :  { %1773 = sst [smem:[#allocation23_spill]] %s1753_s1 }
   0x2   :  { %1774 = sst [smem:[#allocation24_spill]] %s1754_s2 }
   0x3   :  { %1775 = sst [smem:[#allocation25_spill]] %s1755_s3 }
   0x4   :  { %1776 = sst [smem:[#allocation26_spill]] %s1756_s4 }
   0x5   :  { %1777 = sst [smem:[#allocation27_spill]] %s1757_s5 }
   0x6   :  { %1778 = sst [smem:[#allocation28_spill]] %s1758_s6 }
   0x7   :  { %11 = vsyncpa [#allocation8], 0 }
   0x8   :  { %13 = vsyncpa [#allocation8 + $0x1], 0 }
   0x9   :  { %14 = vsyncpa [#allocation11], 0 }
   0xa   :  { %15 = vsyncpa [#allocation9], 0 }
   0xb   :  { %17 = vsyncpa [#allocation9 + $0x1], 0  ;;  %s1403_s21 = smov 0   ;;  %s1405_s22 = smov 0  }
   0xc   :  { %s1407_s23 = smov 0   ;;  %s1409_s24 = smov 0  }
   0xd   :  { %s1411_s25 = smov 0   ;;  %s1413_s26 = smov 0  }
   0xe   :  { %s1415_s27 = smov 0   ;;  %s1417_s28 = smov 0  }
   0xf   :  { %s1419_s29 = smov 0   ;;  %s1421_s30 = smov 0  }
  0x10   :  { %s1423_s7 = smov 0  }
  0x11 LB: > { %1779 = sst [smem:[#allocation17_spill]] %s1317_s21  ;;  %s773_s8 = sadd.s32 4294967295, %s1357_s7   ;;  %s1357_s7 = sphi %s1423_s7, %s23_s7   ;;  %s1353_s30 = sphi %s1421_s30, %s1824_s30   ;;  %s1349_s29 = sphi %s1419_s29, %s1823_s29   ;;  %s1345_s28 = sphi %s1417_s28, %s1816_s28   ;;  %s1341_s27 = sphi %s1415_s27, %s1815_s27   ;;  %s1337_s26 = sphi %s1413_s26, %s1822_s26   ;;  %s1333_s25 = sphi %s1411_s25, %s1821_s25   ;;  %s1329_s24 = sphi %s1409_s24, %s1820_s24   ;;  %s1325_s23 = sphi %s1407_s23, %s1819_s23   ;;  %s1321_s22 = sphi %s1405_s22, %s1818_s22   ;;  %s1317_s21 = sphi %s1403_s21, %s1817_s21  }
  0x12   : > { %1780 = sst [smem:[#allocation18_spill]] %s1341_s27  ;;  %s774_s9 = sadd.s32 4294967294, %s1357_s7  }
  0x13   : > { %1781 = sst [smem:[#allocation19_spill]] %s1349_s29  ;;  %p63_p0 = scmp.ne.s32.totalorder %s1333_s25, %s1329_s24 }
  0x14   : > { %1782 = sst [smem:[#allocation20_spill]] %s1353_s30  ;;  %p1459_p1 = scmp.eq.s32.totalorder %s773_s8, 0 }
  0x15   : > { %p193_p2 = scmp.ne.s32.totalorder %s1325_s23, %s1321_s22  ;;  %p194_p4 = scmp.eq.s32.totalorder %s773_s8, 7 }
  0x16   : > { %s1783_s10 = scalar_select %p1459_p1, 1, 0 }
  0x17   : > { %p1468_p3 = por %p1459_p1, %p63_p0  ;;  %p199_p5 = scmp.ne.s32.totalorder %s1321_s22, %s1317_s21 }
  0x18   : > { %p200_p6 = scmp.eq.s32.totalorder %s774_s9, 7  ;;  %p1474_p7 = por %p194_p4, %p193_p2 }
  0x19   : > { %s1784_s12 = scalar_select %p1468_p3, 1, 0 }
  0x1a   : > { %s1785_s13 = scalar_select %p1474_p7, 1, 0 }
  0x1b   : > { %p775_p8 = scmp.ge.s32.totalorder %s1357_s7, 1  ;;  %p1479_p9 = por %p200_p6, %p199_p5 }
  0x1c   : > { %1786 = sst [smem:[#allocation21_spill]] %s1785_s13  ;;  %p207_p10 = scmp.lt.s32.totalorder %s1357_s7, 9 }
  0x1d   : > { %s1787_s14 = scalar_select %p1479_p9, 1, 0 }
  0x1e   : > { %p1484_p11 = pnand %p775_p8, %p207_p10  ;;  %s1359_s16 = smov [#allocation10]  }
  0x1f   : > { %1788 = sst [smem:[#allocation22_spill]] %s1787_s14  ;;  %s219_s17 = sshll.u32 %s1359_s16, 4  ;;  %s220_s17 = int_to_ptr.vmem [resolvable:$true] %s219_s17 }
  0x20   : > { %s1789_s15 = scalar_select %p1484_p11, 1, 0 }
  0x21   : > { %p1027_p12 = pneg %p1484_p11  ;;  %s1360_s19 = smov [#allocation12]  }
  0x22   : > { %s238_s20 = sshll.u32 %s1360_s19, 4  ;;  %s1791_s1 = sld [smem:[#allocation23_spill]]  ;;  %s1496_s20 = int_to_ptr.vmem [resolvable:$true] %s238_s20 }
  0x23   : > { %p1492_p13 = pnand %p1027_p12, %p1459_p1 }
  0x25   : > { %p1147_p2 = pneg %p1492_p13 }
  0x28   : > { %s1145_s9 = scalar_lea.hbm %s1791_s1, 2048 }
  0x29   : > { %p1146_p0 = scmp.ne.s32.totalorder %s1791_s1, %s1145_s9  ;;  %p1152_p6 = scmp.lt.u32.totalorder %s1145_s9, %s1791_s1 }
  0x2b   : > { %p1148_p4 = pnand %p1147_p2, %p1146_p0 }
  0x2d   : > { %p1149_p5 = pneg %p1148_p4 }
  0x2f   : > { %p1154_p8 = pnand %p1152_p6, %p1149_p5 }
  0x31   : > { %1157 = shalt.err (!%p1154_p8)
}
  0x32   : > { %s1158_s19 = scalar_lea.vmem %s220_s17, 2048  ;;  %p1166_p7 = scmp.lt.s32.totalorder %s220_s17, %s220_s17 }
  0x33   : > { %p1159_p10 = scmp.ne.s32.totalorder %s220_s17, %s1158_s19  ;;  %p1167_p1 = scmp.lt.s32.totalorder %s1158_s19, %s1158_s19 }
  0x35   : > { %p1161_p12 = pnand %p1159_p10, %p1147_p2  ;;  %p1168_p3 = por %p1167_p1, %p1166_p7 }
  0x37   : > { %p1162_p9 = pneg %p1161_p12 }
  0x39   : > { %p1169_p11 = pnand %p1168_p3, %p1162_p9 }
  0x3b   : > { %1172 = shalt.err (!%p1169_p11)
}
  0x3c   : > { %s1769_s11 = smov 128   ;;  %s1770_s24 = smov 8  }
  0x3d   : > { %1030 = dma.hbm_to_vmem [thread:$0]  (!%p1492_p13), %s1791_s1, 2048, %s220_s17, [#allocation11], %s1769_s11, %s1769_s11, %s1770_s24  }
  0x3e   : > { %s1792_s4 = sld [smem:[#allocation26_spill]] }
  0x44   : > { %s1173_s16 = scalar_lea.hbm %s1792_s4, 2048 }
  0x45   : > { %p1174_p1 = scmp.ne.s32.totalorder %s1792_s4, %s1173_s16  ;;  %p1180_p9 = scmp.lt.u32.totalorder %s1173_s16, %s1792_s4 }
  0x47   : > { %p1176_p3 = pnand %p1174_p1, %p1147_p2 }
  0x49   : > { %p1177_p7 = pneg %p1176_p3 }
  0x4b   : > { %p1182_p11 = pnand %p1180_p9, %p1177_p7 }
  0x4d   : > { %1185 = shalt.err (!%p1182_p11)
}
  0x4e   : > { %s1186_s17 = scalar_lea.vmem %s1496_s20, 2048  ;;  %p1194_p6 = scmp.lt.s32.totalorder %s1496_s20, %s1496_s20 }
  0x4f   : > { %p1187_p0 = scmp.ne.s32.totalorder %s1496_s20, %s1186_s17  ;;  %p1195_p8 = scmp.lt.s32.totalorder %s1186_s17, %s1186_s17 }
  0x51   : > { %p1189_p4 = pnand %p1187_p0, %p1147_p2  ;;  %p1196_p10 = por %p1195_p8, %p1194_p6 }
  0x53   : > { %p1190_p5 = pneg %p1189_p4 }
  0x55   : > { %p1197_p12 = pnand %p1196_p10, %p1190_p5 }
  0x57   : > { %1200 = shalt.err (!%p1197_p12)
}
  0x58   : > { %1033 = dma.hbm_to_vmem [thread:$0]  (!%p1492_p13), %s1792_s4, 2048, %s1496_s20, [#allocation11], %s1769_s11, %s1769_s11, %s1770_s24  }
  0x59   : > { %s32_s13 = sadd.s32 1, %s1349_s29  ;;  %s35_s18 = sadd.s32 1, %s1353_s30 }
  0x5a   : > { %p33_p2 = scmp.ge.s32.totalorder %s32_s13, 4  ;;  %s39_s21 = ssub.s32 1, %s1353_s30 }
  0x5b   : > { %s40_s14 = smul.u32 %s1349_s29, %s39_s21  ;;  %s50_s8 = sadd.s32 1, %s1337_s26 }
  0x5c   : > { %s1826_s13 = smov (%p33_p2, %s32_s13), 0  ;;  %s1828_s18 = smov (!%p33_p2, %s35_s18), %s1353_s30 }
  0x5d   : > { %s41_s9 = smul.u32 3, %s1353_s30  ;;  %p57_p1 = scmp.ne.s32.totalorder %s1337_s26, %s1333_s25 }
  0x5e   : > { %p37_p3 = scmp.ge.s32.totalorder %s1828_s18, 2  ;;  %p58_p7 = scmp.eq.s32.totalorder %s1357_s7, 0 }
  0x5f   : > { %s42_s16 = sadd.s32 %s41_s9, %s40_s14  ;;  %s178_s19 = smul.u32 %s1349_s29, %s1353_s30 }
  0x60   : > { %s1830_s18 = smov (%p37_p3, %s1828_s18), 0  ;;  %p1567_p13 = por %p58_p7, %p57_p1 }
  0x61   : > { %p1044_p9 = scmp.lt.s32.totalorder %s1357_s7, 8  ;;  %s43_s17 = ssub.s32 1, %s1830_s18 }
  0x62   : > { %s45_s5 = smul.u32 3, %s1830_s18  ;;  %s255_s21 = sand.u32 1, %s1337_s26  }
  0x63   : > { %s44_s6 = smul.u32 %s43_s17, %s1826_s13  ;;  %s779_s11 = sshll.u32 %s255_s21, 5 }
  0x64   : > { %s179_s14 = smul.u32 %s1830_s18, %s1826_s13  ;;  %s801_s4 = sshll.u32 %s42_s16, 9 }
  0x65   : > { %s46_s9 = sadd.s32 %s45_s5, %s44_s6  ;;  %s1794_s29 = sadd.s32 1, %s1325_s23 }
  0x66   : > { %s47_s24 = ssub.s32 %s42_s16, %s46_s9  ;;  %s180_s1 = ssub.s32 %s178_s19, %s179_s14 }
  0x67   : > { %p48_p11 = scmp.eq.s32.totalorder %s47_s24, 0  ;;  %p181_p0 = scmp.eq.s32.totalorder %s180_s1, 0 }
  0x68   : > { %s1589_s17 = scalar_lea.hbm %s1752_s0, %s801_s4  ;;  %s259_s5 = scalar_lea.vmem [#allocation7], %s779_s11 }
  0x69   : > { %s1579_s30 = scalar_select %p48_p11, %s1337_s26, %s50_s8  }
  0x6a   : > { %s1584_s3 = scalar_select %p181_p0, %s1325_s23, %s1794_s29  }
  0x6b   : > { %s270_s6 = sshll.u32 %s259_s5, 4  ;;  %p1597_p4 = pnand %p1044_p9, %p1567_p13  ;;  %s1591_s6 = int_to_ptr.vmem [resolvable:$true] %s270_s6 }
  0x6c   : > { %s1601_s29 = scalar_lea.sflag [#allocation8], %s255_s21  ;;  %s1201_s2 = scalar_lea.hbm %s1589_s17, 512 }
  0x6d   : > { %p1202_p5 = scmp.ne.s32.totalorder %s1589_s17, %s1201_s2  ;;  %p1203_p6 = pneg %p1597_p4 }
  0x6e   : > { %s1206_s11 = scalar_lea.hbm %s1752_s0, 2048  ;;  %p1207_p12 = scmp.lt.u32.totalorder %s1589_s17, %s1752_s0 }
  0x6f   : > { %p1204_p8 = pnand %p1203_p6, %p1202_p5  ;;  %p1208_p2 = scmp.lt.u32.totalorder %s1206_s11, %s1201_s2 }
  0x70   : > { %p1210_p3 = scmp.lt.u32.totalorder %s1201_s2, %s1589_s17 }
  0x71   : > { %p1205_p10 = pneg %p1204_p8  ;;  %p1209_p1 = por %p1208_p2, %p1207_p12 }
  0x73   : > { %p1211_p7 = por %p1210_p3, %p1209_p1 }
  0x75   : > { %p1212_p13 = pnand %p1211_p7, %p1205_p10 }
  0x77   : > { %1215 = shalt.err (!%p1212_p13)
}
  0x78   : > { %s1216_s16 = scalar_lea.vmem %s1591_s6, 512  ;;  %s1363_s19 = smov [#allocation7]  }
  0x79   : > { %p1217_p9 = scmp.ne.s32.totalorder %s1591_s6, %s1216_s16  ;;  %s1221_s20 = sshll.u32 %s1363_s19, 4  ;;  %s1222_s20 = int_to_ptr.vmem [resolvable:$false] %s1221_s20 }
  0x7a   : > { %s1223_s21 = scalar_lea.vmem %s1222_s20, 1024  ;;  %p1224_p5 = scmp.lt.s32.totalorder %s1591_s6, %s1222_s20 }
  0x7b   : > { %p1219_p11 = pnand %p1217_p9, %p1203_p6  ;;  %p1225_p8 = scmp.lt.s32.totalorder %s1223_s21, %s1216_s16 }
  0x7d   : > { %p1220_p0 = pneg %p1219_p11  ;;  %p1226_p12 = por %p1225_p8, %p1224_p5 }
  0x7f   : > { %p1227_p2 = pnand %p1226_p12, %p1220_p0 }
  0x81   : > { %1230 = shalt.err (!%p1227_p2)
}
  0x82   : > { %s1796_s14 = smov 8   ;;  %s1797_s9 = smov 128  }
  0x83   : > { %1037 = dma.hbm_to_vmem [thread:$0]  (!%p1597_p4), %s1589_s17, 512, %s1591_s6, %s1601_s29, %s1797_s9, %s1797_s9, %s1796_s14  }
  0x84   : > { %p1798_p6 = scmp.ne.s32.totalorder %s1789_s15, 0 }
  0x85   : > { %s284_s5 = sand.u32 (!%p1798_p6), 1, %s1333_s25   ;;  %p1799_p10 = scmp.ne.s32.totalorder (!%p1798_p6), %s1784_s12, 0 }
  0x86   : > { %282 = sbr.rel (%p1798_p6) target bundleno = 752 (0x2f0), region = 44  ;;  %s783_s2 = sshll.u32 (!%p1798_p6), %s284_s5, 5 }
  0x87   : > { %s285_s4 = scalar_lea.sflag (!%p1798_p6), [#allocation8], %s284_s5  ;;  %s1635_s27 = scalar_lea.vmem (!%p1798_p6), [#allocation7], %s783_s2 }
  0x8d   : > { %1304 = dma.done.wait (%p1799_p10), %s285_s4, 512  }
  0x8e   : > { %1306 = vsyncadd (%p1799_p10), %s285_s4, 4294966784  ;;  %p1800_p1 = scmp.ne.s32.totalorder %s1783_s10, 0 }
  0x90   : > { %1308 = dma.done.wait (%p1800_p1), [#allocation11], 4096  }
  0x91   : > { %1310 = vsyncadd (%p1800_p1), [#allocation11], 4294963200  ;;  %s322_s15 = sand.u32 1, %s1321_s22   ;;  %p787_p4 = scmp.ne.s32.totalorder %s1345_s28, 0 }
  0x92   : > { %s786_s17 = sshll.u32 %s322_s15, 5  ;;  %s1801_s1 = sld [smem:[#allocation18_spill]] (!%p787_p4) }
  0x93   : > { %s1648_s6 = scalar_lea.vmem [#allocation13], %s786_s17  ;;  %335 = sbr.rel (%p787_p4) target bundleno = 432 (0x1b0), region = 60 }
  0x98   : > { %p788_p3 = scmp.ne.s32.totalorder (!%p787_p4), %s1801_s1, 0 }
  0x9a   : > { %339 = sbr.rel (%p788_p3) target bundleno = 161 (0xa1), region = 64  ;;  %v1364_v0 = vmov (!%p788_p3), 0.0  }
  0x9b   : > { %340 = vst [vmem:[#allocation3] sm:$0x1] (!%p788_p3), %v1364_v0  ;;  %341 = vst [vmem:[#allocation4] sm:$0x1] (!%p788_p3), %v1364_v0 }
  0xa1 PF: > { %v346_v1 = vld [vmem:[#allocation10] sm:$0xff]  ;;  %v347_v2 = vld [vmem:[#allocation10 + $0x8] sm:$0xff]  ;;  %v348_v3 = vld [vmem:[#allocation10 + $0x10] sm:$0xff]  ;;  %s1802_s10 = sld [smem:[#allocation18_spill]] }
  0xa2   : > { %v919_v4 = vpack.c.bf16 %v347_v2, %v346_v1  ;;  %v349_v5 = vld [vmem:[#allocation10 + $0x18] sm:$0xff]  ;;  %v350_v7 = vld [vmem:[#allocation10 + $0x20] sm:$0xff]  ;;  %v351_v8 = vld [vmem:[#allocation10 + $0x28] sm:$0xff] }
  0xa3   : > { %v923_v6 = vpack.c.bf16 %v349_v5, %v348_v3  ;;  %v927_v9 = vpack.c.bf16 %v351_v8, %v350_v7  ;;  %v342_v10 = vld [vmem:[%s1635_s27] sm:$0xff]  ;;  %v352_v11 = vld [vmem:[#allocation10 + $0x30] sm:$0xff]  ;;  %v353_v12 = vld [vmem:[#allocation10 + $0x38] sm:$0xff] }
  0xa4   : > { %920 = vmatprep.subr.bf16.mxu0 %v919_v4  ;;  %983 = vmatprep.subr.bf16.mxu1 %v919_v4  ;;  %v344_v13 = vld [vmem:[%s1635_s27 + $0x10] sm:$0xff]  ;;  %v931_v14 = vpack.c.bf16 %v353_v12, %v352_v11  ;;  %v354_v15 = vld [vmem:[#allocation10 + $0x40] sm:$0xff]  ;;  %v355_v16 = vld [vmem:[#allocation10 + $0x48] sm:$0xff] }
  0xa5   : > { %922 = vmatpush3.bf16.msra.mxu0 %v919_v4  ;;  %991 = vmatpush3.bf16.msra.mxu1 %v919_v4  ;;  %v935_v17 = vpack.c.bf16 %v355_v16, %v354_v15  ;;  %v356_v18 = vld [vmem:[#allocation10 + $0x50] sm:$0xff]  ;;  %v357_v19 = vld [vmem:[#allocation10 + $0x58] sm:$0xff]  ;;  %v358_v21 = vld [vmem:[#allocation10 + $0x60] sm:$0xff] }
  0xa6   : > { %924 = vmatprep.subr.bf16.mxu0 %v923_v6  ;;  %984 = vmatprep.subr.bf16.mxu1 %v923_v6  ;;  %v939_v20 = vpack.c.bf16 %v357_v19, %v356_v18  ;;  %v359_v22 = vld [vmem:[#allocation10 + $0x68] sm:$0xff]  ;;  %v360_v24 = vld [vmem:[#allocation10 + $0x70] sm:$0xff]  ;;  %v361_v25 = vld [vmem:[#allocation10 + $0x78] sm:$0xff] }
  0xa7   : > { %875 = vmatprep.mubr.f32.mxu0 %v342_v10  ;;  %878 = vmatprep.mubr.f32.mxu1 %v344_v13  ;;  %v943_v23 = vpack.c.bf16 %v359_v22, %v358_v21  ;;  %v947_v26 = vpack.c.bf16 %v361_v25, %v360_v24  ;;  %v343_v27 = vld [vmem:[%s1635_s27 + $0x8] sm:$0xff]  ;;  %v345_v28 = vld [vmem:[%s1635_s27 + $0x18] sm:$0xff]  ;;  %s789_s12 = sshll.u32 %s1802_s10, 5 }
  0xa8   : > { %s476_s29 = scalar_lea.vmem [#allocation2], %s789_s12  ;;  %v447_v52 = vld [vmem:[#allocation3] sm:$0x1]  ;;  %v459_v55 = vld [vmem:[#allocation4] sm:$0x1] }
  0xa9   : > { %926 = vmatpush3.bf16.msra.mxu0 %v923_v6  ;;  %992 = vmatpush3.bf16.msra.mxu1 %v923_v6 }
  0xaa   : > { %928 = vmatprep.subr.bf16.mxu0 %v927_v9  ;;  %985 = vmatprep.subr.bf16.mxu1 %v927_v9 }
  0xad   : > { %930 = vmatpush3.bf16.msra.mxu0 %v927_v9  ;;  %993 = vmatpush3.bf16.msra.mxu1 %v927_v9 }
  0xae   : > { %932 = vmatprep.subr.bf16.mxu0 %v931_v14  ;;  %986 = vmatprep.subr.bf16.mxu1 %v931_v14 }
  0xb1   : > { %934 = vmatpush3.bf16.msra.mxu0 %v931_v14  ;;  %994 = vmatpush3.bf16.msra.mxu1 %v931_v14 }
  0xb2   : > { %936 = vmatprep.subr.bf16.mxu0 %v935_v17  ;;  %987 = vmatprep.subr.bf16.mxu1 %v935_v17 }
  0xb5   : > { %938 = vmatpush3.bf16.msra.mxu0 %v935_v17  ;;  %995 = vmatpush3.bf16.msra.mxu1 %v935_v17 }
  0xb6   : > { %940 = vmatprep.subr.bf16.mxu0 %v939_v20  ;;  %988 = vmatprep.subr.bf16.mxu1 %v939_v20 }
  0xb9   : > { %942 = vmatpush3.bf16.msra.mxu0 %v939_v20  ;;  %996 = vmatpush3.bf16.msra.mxu1 %v939_v20 }
  0xba   : > { %944 = vmatprep.subr.bf16.mxu0 %v943_v23  ;;  %989 = vmatprep.subr.bf16.mxu1 %v943_v23 }
  0xbd   : > { %946 = vmatpush3.bf16.msra.mxu0 %v943_v23  ;;  %997 = vmatpush3.bf16.msra.mxu1 %v943_v23 }
  0xbe   : > { %948 = vmatprep.subr.bf16.mxu0 %v947_v26  ;;  %990 = vmatprep.subr.bf16.mxu1 %v947_v26 }
  0xc1   : > { %950 = vmatpush3.bf16.msra.mxu0 %v947_v26  ;;  %998 = vmatpush3.bf16.msra.mxu1 %v947_v26 }
  0xc4   : > { %876 = vmatmul.mubr.f32.vlgmr.msra.gmra.mrb[0].mxu0 %v343_v27  ;;  %879 = vmatmul.mubr.f32.vlgmr.msra.gmra.mrb[0].mxu1 %v345_v28 }
 0x197   : > { %v877_v29 = vpop.f32.mrb[0].mxu0  ;;  %v880_v30 = vpop.f32.mrb[0].mxu1 }
 0x198   : > { %v461_v31 = vmul.f32 %v877_v29, %v877_v29  ;;  %478 = vst [vmem:[%s476_s29 + $0x8] sm:$0xff] %v877_v29  ;;  %v428_v32 = vpop.f32.mrb[1].mxu0  ;;  %480 = vst [vmem:[%s476_s29 + $0x18] sm:$0xff] %v880_v30  ;;  %v438_v33 = vpop.f32.mrb[1].mxu1  ;;  %v463_v39 = vmul.f32 %v880_v30, %v880_v30 }
 0x199   : > { %v448_v34 = vadd.f32 %v877_v29, %v428_v32  ;;  %v460_v35 = vmul.f32 %v428_v32, %v428_v32  ;;  %477 = vst [vmem:[%s476_s29] sm:$0xff] %v428_v32  ;;  %v462_v36 = vmul.f32 %v438_v33, %v438_v33  ;;  %479 = vst [vmem:[%s476_s29 + $0x10] sm:$0xff] %v438_v33 }
 0x19b   : > { %v464_v37 = vadd.f32 %v461_v31, %v460_v35  ;;  %v449_v38 = vadd.f32 %v448_v34, %v438_v33 }
 0x19d   : > { %v450_v40 = vadd.f32 %v880_v30, %v449_v38  ;;  %v465_v41 = vadd.f32 %v464_v37, %v462_v36 }
 0x19f   : > { %v451_v42 = vrot.slane %v450_v40, 4  ;;  %v466_v43 = vadd.f32 %v465_v41, %v463_v39 }
 0x1a1   : > { %v452_v44 = vadd.f32 %v451_v42, %v450_v40  ;;  %v467_v45 = vrot.slane %v466_v43, 4 }
 0x1a3   : > { %v453_v46 = vrot.slane %v452_v44, 2  ;;  %v468_v47 = vadd.f32 %v467_v45, %v466_v43 }
 0x1a5   : > { %v454_v48 = vadd.f32 %v453_v46, %v452_v44  ;;  %v469_v49 = vrot.slane %v468_v47, 2 }
 0x1a7   : > { %v455_v50 = vrot.slane %v454_v48, 1  ;;  %v470_v51 = vadd.f32 %v469_v49, %v468_v47 }
 0x1a9   : > { %v456_v53 = vadd.f32 %v455_v50, %v454_v48  ;;  %v471_v54 = vrot.slane %v470_v51, 1 }
 0x1ab   : > { %v457_v56 = vadd.f32 %v456_v53, %v447_v52  ;;  %v472_v57 = vadd.f32 %v471_v54, %v470_v51 }
 0x1ad   : > { %458 = vst [vmem:[#allocation3] sm:$0x1] %v457_v56  ;;  %v473_v58 = vadd.f32 %v472_v57, %v459_v55 }
 0x1af   : > { %474 = vst [vmem:[#allocation4] sm:$0x1] %v473_v58 }
 0x1b0 PF: > { %p790_p7 = scmp.ne.s32.totalorder %s1345_s28, 1 }
 0x1b1   : > { %s1803_s11 = sld [smem:[#allocation18_spill]] (!%p790_p7) }
 0x1b2   : > { %484 = sbr.rel (%p790_p7) target bundleno = 721 (0x2d1), region = 68 }
 0x1b7   : > { %p791_p13 = scmp.ne.s32.totalorder (!%p790_p7), %s1803_s11, 0 }
 0x1b9   : > { %488 = sbr.rel (%p791_p13) target bundleno = 470 (0x1d6), region = 72  ;;  %v489_v59 = vld [vmem:[#allocation3] sm:$0x1] (!%p791_p13)  ;;  %v491_v60 = vld [vmem:[#allocation4] sm:$0x1] (!%p791_p13)  ;;  %s1804_s16 = sld [smem:[#allocation24_spill]] (!%p791_p13) }
 0x1ba   : > { %v490_v61 = vmul.f32 (!%p791_p13), 0.0078125, %v489_v59  ;;  %v492_v62 = vmul.f32 (!%p791_p13), 0.0078125, %v491_v60  ;;  %s1805_s21 = sld [smem:[#allocation25_spill]] (!%p791_p13) }
 0x1bc   : > { %v493_v63 = vmul.f32 (!%p791_p13), %v490_v61, %v490_v61 }
 0x1be   : > { %v494_v0 = vsub.f32 (!%p791_p13), %v492_v62, %v493_v63 }
 0x1bf   : > { %v496_v3 = vld [vmem:[%s1804_s16] sm:$0x1] (!%p791_p13) }
 0x1c0   : > { %v495_v1 = vmax.f32 %v494_v0, 0.0  ;;  %v501_v6 = vld [vmem:[%s1805_s21] sm:$0x1] }
 0x1c2   : > { %v497_v2 = vadd.f32 1e-05, %v495_v1 }
 0x1c4   : > { %1143 = vrsqrt.f32 %v497_v2 }
 0x1ce   : > { %v1144_v4 = vpop.eup %1143 }
 0x1cf   : > { %v499_v5 = vmul.f32 %v1144_v4, %v496_v3 }
 0x1d1   : > { %500 = vst [vmem:[#allocation5] sm:$0x1] %v499_v5  ;;  %v502_v7 = vmul.f32 %v499_v5, %v490_v61 }
 0x1d3   : > { %v503_v8 = vsub.f32 %v501_v6, %v502_v7 }
 0x1d5   : > { %504 = vst [vmem:[#allocation6] sm:$0x1] %v503_v8 }
 0x1d6 PF: > { %v537_v9 = vld [vmem:[#allocation12] sm:$0xff]  ;;  %s1806_s14 = sld [smem:[#allocation18_spill]]  ;;  %v538_v10 = vld [vmem:[#allocation12 + $0x8] sm:$0xff]  ;;  %v539_v11 = vld [vmem:[#allocation12 + $0x10] sm:$0xff]  ;;  %s1807_s27 = sld [smem:[#allocation27_spill]] }
 0x1d7   : > { %v951_v12 = vpack.c.bf16 %v538_v10, %v537_v9  ;;  %v540_v13 = vld [vmem:[#allocation12 + $0x18] sm:$0xff]  ;;  %v541_v15 = vld [vmem:[#allocation12 + $0x20] sm:$0xff]  ;;  %v542_v16 = vld [vmem:[#allocation12 + $0x28] sm:$0xff] }
 0x1d8   : > { %v955_v14 = vpack.c.bf16 %v540_v13, %v539_v11  ;;  %v959_v17 = vpack.c.bf16 %v542_v16, %v541_v15  ;;  %v543_v18 = vld [vmem:[#allocation12 + $0x30] sm:$0xff]  ;;  %v793_v20 = vld [vmem:[#allocation5] ss:$0 sm:$0xff]  ;;  %v545_v29 = vld [vmem:[#allocation12 + $0x40] sm:$0xff] }
 0x1d9   : > { %952 = vmatprep.subr.bf16.mxu0 %v951_v12  ;;  %999 = vmatprep.subr.bf16.mxu1 %v951_v12  ;;  %v544_v21 = vld [vmem:[#allocation12 + $0x38] sm:$0xff]  ;;  %v546_v30 = vld [vmem:[#allocation12 + $0x48] sm:$0xff]  ;;  %v547_v34 = vld [vmem:[#allocation12 + $0x50] sm:$0xff] }
 0x1da   : > { %954 = vmatpush3.bf16.msra.mxu0 %v951_v12  ;;  %1007 = vmatpush3.bf16.msra.mxu1 %v951_v12  ;;  %v963_v27 = vpack.c.bf16 %v544_v21, %v543_v18  ;;  %v967_v33 = vpack.c.bf16 %v546_v30, %v545_v29  ;;  %v548_v35 = vld [vmem:[#allocation12 + $0x58] sm:$0xff]  ;;  %v549_v37 = vld [vmem:[#allocation12 + $0x60] sm:$0xff]  ;;  %v550_v38 = vld [vmem:[#allocation12 + $0x68] sm:$0xff] }
 0x1db   : > { %956 = vmatprep.subr.bf16.mxu0 %v955_v14  ;;  %1000 = vmatprep.subr.bf16.mxu1 %v955_v14  ;;  %v971_v36 = vpack.c.bf16 %v548_v35, %v547_v34  ;;  %v975_v41 = vpack.c.bf16 %v550_v38, %v549_v37  ;;  %v551_v42 = vld [vmem:[#allocation12 + $0x70] sm:$0xff]  ;;  %v552_v43 = vld [vmem:[#allocation12 + $0x78] sm:$0xff] }
 0x1dc   : > { %s792_s9 = sshll.u32 %s1806_s14, 5  ;;  %v794_v23 = vld [vmem:[#allocation6] ss:$0 sm:$0xff]  ;;  %v979_v46 = vpack.c.bf16 %v552_v43, %v551_v42  ;;  %v795_v51 = vld [vmem:[%s1807_s27] ss:$0 sm:$0xff] }
 0x1dd   : > { %s1666_s5 = scalar_lea.vmem [#allocation2], %s792_s9 }
 0x1de   : > { %v507_v19 = vld [vmem:[%s1666_s5] sm:$0xff]  ;;  %v509_v24 = vld [vmem:[%s1666_s5 + $0x10] sm:$0xff]  ;;  %958 = vmatpush3.bf16.msra.mxu0 %v955_v14  ;;  %1008 = vmatpush3.bf16.msra.mxu1 %v955_v14  ;;  %v508_v39 = vld [vmem:[%s1666_s5 + $0x8] sm:$0xff] }
 0x1df   : > { %v518_v22 = vmul.f32 %v793_v20, %v507_v19  ;;  %v520_v25 = vmul.f32 %v793_v20, %v509_v24  ;;  %960 = vmatprep.subr.bf16.mxu0 %v959_v17  ;;  %1001 = vmatprep.subr.bf16.mxu1 %v959_v17  ;;  %v510_v40 = vld [vmem:[%s1666_s5 + $0x18] sm:$0xff]  ;;  %v519_v44 = vmul.f32 %v793_v20, %v508_v39 }
 0x1e0   : > { %v521_v45 = vmul.f32 %v793_v20, %v510_v40 }
 0x1e1   : > { %v529_v26 = vadd.f32 %v794_v23, %v518_v22  ;;  %v531_v28 = vadd.f32 %v794_v23, %v520_v25  ;;  %v530_v47 = vadd.f32 %v794_v23, %v519_v44 }
 0x1e2   : > { %962 = vmatpush3.bf16.msra.mxu0 %v959_v17  ;;  %1009 = vmatpush3.bf16.msra.mxu1 %v959_v17  ;;  %v532_v48 = vadd.f32 %v794_v23, %v521_v45 }
 0x1e3   : > { %v533_v31 = vmax.f32 %v529_v26, 0.0  ;;  %v535_v32 = vmax.f32 %v531_v28, 0.0  ;;  %964 = vmatprep.subr.bf16.mxu0 %v963_v27  ;;  %1002 = vmatprep.subr.bf16.mxu1 %v963_v27  ;;  %v534_v49 = vmax.f32 %v530_v47, 0.0 }
 0x1e4   : > { %v536_v50 = vmax.f32 %v532_v48, 0.0 }
 0x1e5   : > { %913 = vmatprep.mubr.f32.mxu0 %v533_v31  ;;  %916 = vmatprep.mubr.f32.mxu1 %v535_v32 }
 0x1e6   : > { %966 = vmatpush3.bf16.msra.mxu0 %v963_v27  ;;  %1010 = vmatpush3.bf16.msra.mxu1 %v963_v27 }
 0x1e7   : > { %968 = vmatprep.subr.bf16.mxu0 %v967_v33  ;;  %1003 = vmatprep.subr.bf16.mxu1 %v967_v33 }
 0x1ea   : > { %970 = vmatpush3.bf16.msra.mxu0 %v967_v33  ;;  %1011 = vmatpush3.bf16.msra.mxu1 %v967_v33 }
 0x1eb   : > { %972 = vmatprep.subr.bf16.mxu0 %v971_v36  ;;  %1004 = vmatprep.subr.bf16.mxu1 %v971_v36 }
 0x1ee   : > { %974 = vmatpush3.bf16.msra.mxu0 %v971_v36  ;;  %1012 = vmatpush3.bf16.msra.mxu1 %v971_v36 }
 0x1ef   : > { %976 = vmatprep.subr.bf16.mxu0 %v975_v41  ;;  %1005 = vmatprep.subr.bf16.mxu1 %v975_v41 }
 0x1f2   : > { %978 = vmatpush3.bf16.msra.mxu0 %v975_v41  ;;  %1013 = vmatpush3.bf16.msra.mxu1 %v975_v41 }
 0x1f3   : > { %980 = vmatprep.subr.bf16.mxu0 %v979_v46  ;;  %1006 = vmatprep.subr.bf16.mxu1 %v979_v46 }
 0x1f6   : > { %982 = vmatpush3.bf16.msra.mxu0 %v979_v46  ;;  %1014 = vmatpush3.bf16.msra.mxu1 %v979_v46 }
 0x1f9   : > { %914 = vmatmul.mubr.f32.vlgmr.msra.gmra.mrb[0].mxu0 %v534_v49  ;;  %917 = vmatmul.mubr.f32.vlgmr.msra.gmra.mrb[0].mxu1 %v536_v50 }
 0x2cc   : > { %v915_v52 = vpop.f32.mrb[0].mxu0  ;;  %v918_v53 = vpop.f32.mrb[0].mxu1 }
 0x2cd   : > { %v632_v54 = vadd.f32 %v915_v52, %v795_v51  ;;  %v642_v55 = vadd.f32 %v918_v53, %v795_v51  ;;  %v626_v56 = vpop.f32.mrb[1].mxu0  ;;  %v636_v57 = vpop.f32.mrb[1].mxu1 }
 0x2ce   : > { %v627_v58 = vadd.f32 %v795_v51, %v626_v56  ;;  %v637_v59 = vadd.f32 %v795_v51, %v636_v57 }
 0x2cf   : > { %646 = vst [vmem:[%s1648_s6 + $0x8] sm:$0xff] %v632_v54  ;;  %648 = vst [vmem:[%s1648_s6 + $0x18] sm:$0xff] %v642_v55 }
 0x2d0   : > { %645 = vst [vmem:[%s1648_s6] sm:$0xff] %v627_v58  ;;  %647 = vst [vmem:[%s1648_s6 + $0x10] sm:$0xff] %v637_v59 }
 0x2d1 PF: > { %s1808_s17 = sld [smem:[#allocation18_spill]]  ;;  %s1809_s1 = sld [smem:[#allocation21_spill]] }
 0x2d2   : > { %s664_s12 = sshll.u32 %s1648_s6, 4  ;;  %s1810_s8 = sld [smem:[#allocation28_spill]]  ;;  %s1682_s12 = int_to_ptr.vmem [resolvable:$true] %s664_s12 }
 0x2d3   : > { %s1691_s19 = scalar_lea.sflag [#allocation9], %s322_s15  ;;  %s1231_s20 = scalar_lea.vmem %s1682_s12, 512 }
 0x2d4   : > { %p1232_p9 = scmp.ne.s32.totalorder %s1682_s12, %s1231_s20 }
 0x2d7   : > { %s657_s10 = smul.u32 %s1808_s17, %s1345_s28  ;;  %p1811_p11 = scmp.ne.s32.totalorder %s1809_s1, 0 }
 0x2d8   : > { %s1365_s28 = smov [#allocation13]  }
 0x2d9   : > { %s802_s29 = sshll.u32 %s657_s10, 9  ;;  %p1233_p0 = pnand %p1232_p9, %p1811_p11 }
 0x2da   : > { %s1687_s16 = scalar_lea.hbm %s1810_s8, %s802_s29  ;;  %s1235_s6 = sshll.u32 %s1365_s28, 4  ;;  %s1236_s6 = int_to_ptr.vmem [resolvable:$false] %s1235_s6 }
 0x2db   : > { %p1234_p5 = pneg %p1233_p0  ;;  %s1237_s21 = scalar_lea.vmem %s1236_s6, 1024 }
 0x2dc   : > { %p1238_p8 = scmp.lt.s32.totalorder %s1682_s12, %s1236_s6  ;;  %p1239_p12 = scmp.lt.s32.totalorder %s1237_s21, %s1231_s20 }
 0x2de   : > { %p1240_p2 = por %p1239_p12, %p1238_p8 }
 0x2e0   : > { %p1241_p6 = pnand %p1240_p2, %p1234_p5 }
 0x2e2   : > { %1244 = shalt.err (!%p1241_p6)
}
 0x2e3   : > { %s1245_s15 = scalar_lea.hbm %s1687_s16, 512  ;;  %s1249_s5 = scalar_lea.hbm %s1810_s8, 2048 }
 0x2e4   : > { %p1246_p10 = scmp.ne.s32.totalorder %s1687_s16, %s1245_s15  ;;  %p1250_p3 = scmp.lt.u32.totalorder %s1687_s16, %s1810_s8 }
 0x2e5   : > { %p1251_p7 = scmp.lt.u32.totalorder %s1249_s5, %s1245_s15  ;;  %p1253_p9 = scmp.lt.u32.totalorder %s1245_s15, %s1687_s16 }
 0x2e6   : > { %p1247_p1 = pnand %p1246_p10, %p1811_p11 }
 0x2e7   : > { %p1252_p13 = por %p1251_p7, %p1250_p3 }
 0x2e8   : > { %p1248_p4 = pneg %p1247_p1 }
 0x2e9   : > { %p1254_p0 = por %p1253_p9, %p1252_p13 }
 0x2eb   : > { %p1255_p5 = pnand %p1254_p0, %p1248_p4 }
 0x2ed   : > { %1258 = shalt.err (!%p1255_p5)
}
 0x2ee   : > { %s1366_s27 = smov 128   ;;  %s1367_s17 = smov 8  }
 0x2ef   : > { %1025 = dma.vmem_to_hbm [thread:$0]  (%p1811_p11), %s1682_s12, 512, %s1687_s16, %s1691_s19, %s1366_s27, %s1366_s27, %s1367_s17  }
 0x2f0 PF: > { %s1812_s10 = sld [smem:[#allocation17_spill]]  ;;  %s1813_s29 = sld [smem:[#allocation22_spill]] }
 0x2f1   : > { %p1047_p8 = scmp.ge.s32.totalorder %s1357_s7, 2 }
 0x2f6   : > { %s679_s11 = sand.u32 1, %s1812_s10   ;;  %p1814_p12 = scmp.ne.s32.totalorder %s1813_s29, 0 }
 0x2f7   : > { %s680_s24 = scalar_lea.sflag [#allocation9], %s679_s11 }
 0x2f8   : > { %p1039_p2 = pnand %p1047_p8, %p1814_p12 }
 0x2fa   : > { %1312 = dma.done.wait (!%p1039_p2), %s680_s24, 512  }
 0x2fb   : > { %1314 = vsyncadd (!%p1039_p2), %s680_s24, 4294966784  ;;  %s23_s7 = sadd.s32 1, %s1357_s7   ;;  %s1815_s27 = sld [smem:[#allocation19_spill]] }
 0x2fc   : > { %p20_p6 = scmp.ge.s32.totalorder %s23_s7, 10   ;;  %s1816_s28 = sld [smem:[#allocation20_spill]] }
 0x2fd   : > { %s1817_s21 = smov %s1321_s22  ;;  %s1818_s22 = smov %s1325_s23 }
 0x2fe   : > { %s1819_s23 = smov %s1584_s3  ;;  %s1820_s24 = smov %s1333_s25 }
 0x2ff   : > { %s1821_s25 = smov %s1337_s26  ;;  %s1822_s26 = smov %s1579_s30 }
 0x300   : > { %s1823_s29 = smov %s1826_s13  ;;  %s1824_s30 = smov %s1830_s18 }
 0x301   :  { %22 = sbr.rel (!%p20_p6) target bundleno = 17 (0x11), region = 115 }
 0x308   :  { %685 = vsyncpa [#allocation8], 1 }
 0x309   :  { %687 = vsyncpa [#allocation8 + $0x1], 1 }
 0x30a   :  { %688 = vsyncpa [#allocation11], 1 }
 0x30b   :  { %689 = vsyncpa [#allocation9], 1 }
 0x30c   :  { %691 = vsyncpa [#allocation9 + $0x1], 1 }

</bundles_post_ra>
